<compile_context>
chip_gen: v6e
topology: v6e:2x2x1
jax: 0.10.0
libtpu: 0.0.40
codegen_flags: <defaults>
</compile_context>

<pallas_src>
import jax
import jax.numpy as jnp
import numpy as np
from jax.experimental import pallas as pl
from jax.experimental.pallas import tpu as pltpu

EPS = 1e-5  # PyTorch InstanceNorm2d default eps


def _trans_down_kernel(p_ref, w_ref, o_ref):
    # p_ref: (K, P) bf16  im2col patches for one sample, P (=H_out*W_out) on lanes
    # w_ref: (C, K) bf16  conv weight, flattened (c_in, kh, kw) per out channel
    # o_ref: (C, P) f32   output (channels x flattened spatial)
    conv = jnp.dot(w_ref[...], p_ref[...],
                   preferred_element_type=jnp.float32)            # (C, P), MXU, f32 acc

    # InstanceNorm2d (affine=False): per-sample, per-channel over spatial dims,
    # biased variance, eps=1e-5.  One-pass lane reduction: var = E[x^2] - mean^2.
    inv_p = 1.0 / conv.shape[-1]
    mean = jnp.sum(conv, axis=-1, keepdims=True) * inv_p          # (C, 1)
    ex2 = jnp.sum(conv * conv, axis=-1, keepdims=True) * inv_p    # (C, 1)
    var = jnp.maximum(ex2 - mean * mean, 0.0)
    normed = (conv - mean) * jax.lax.rsqrt(var + EPS)

    # ReLU
    o_ref[...] = jnp.maximum(normed, 0.0).astype(o_ref.dtype)


def _im2col_nkp(x_nchw):
    """3x3 / stride-2 / pad-1 patches in NCHW. Returns (N, 9*C, H_out*W_out).

    K ordering is (c_in, kh, kw), matching weight.reshape(C_out, C_in*9).
    """
    N, C, H, W = x_nchw.shape
    H_out = (H + 2 - 3) // 2 + 1
    W_out = (W + 2 - 3) // 2 + 1
    x_pad = jnp.pad(x_nchw, ((0, 0), (0, 0), (1, 1), (1, 1)))
    taps = []
    for kh in range(3):
        for kw in range(3):
            taps.append(x_pad[:, :, kh:kh + 2 * (H_out - 1) + 1:2,
                                    kw:kw + 2 * (W_out - 1) + 1:2])
    patches = jnp.stack(taps, axis=2)                 # (N, C, 9, H_out, W_out)
    patches = patches.reshape(N, C * 9, H_out * W_out)
    return patches, H_out, W_out


def trans_down(x_nchw, weight, bias=None):
    """x_nchw: (N, C_in, H, W); weight: (C_out, C_in, 3, 3); bias: unused.

    The conv bias is mathematically cancelled by InstanceNorm's mean
    subtraction, so it is dropped from the kernel entirely.
    """
    del bias
    N, C_in, H, W = x_nchw.shape
    C_out = weight.shape[0]

    # bf16 operands for the MXU; accumulation and normalization stay in f32.
    x_bf = x_nchw.astype(jnp.bfloat16)
    # TODO(synk): build the 9 taps inside the kernel (phase-decomposed, unstrided
    # slices of the padded input) to remove the remaining im2col HBM expansion.
    patches, H_out, W_out = _im2col_nkp(x_bf)                 # (N, K, P) bf16
    P = H_out * W_out
    K = 9 * C_in

    # weight[o, c, kh, kw] -> (C_out, C_in*9), same (c, kh, kw) order as patches.
    w_flat = weight.reshape(C_out, K).astype(jnp.bfloat16)

    flops = 2 * N * C_out * K * P + 8 * N * C_out * P
    bytes_accessed = patches.size * 2 + w_flat.size * 2 + N * C_out * P * 4
    cost = pl.CostEstimate(flops=flops, transcendentals=N * C_out,
                           bytes_accessed=bytes_accessed)

    out_flat = pl.pallas_call(
        _trans_down_kernel,
        out_shape=jax.ShapeDtypeStruct((N, C_out, P), jnp.float32),
        grid_spec=pltpu.PrefetchScalarGridSpec(
            num_scalar_prefetch=0,
            grid=(N,),
            in_specs=[
                pl.BlockSpec((pl.Squeezed(), K, P), lambda n: (n, 0, 0)),
                pl.BlockSpec((C_out, K), lambda n: (0, 0)),
            ],
            out_specs=pl.BlockSpec((pl.Squeezed(), C_out, P),
                                   lambda n: (n, 0, 0)),
        ),
        compiler_params=pltpu.CompilerParams(
            dimension_semantics=("parallel",)),
        cost_estimate=cost,
    )(patches, w_flat)

    # TODO(synk): at realistic DenseNet sizes on v7x (64 MiB VMEM), tile P with
    # sum/sum^2 VMEM scratch accumulators and finalize the norm under pl.when.
    return out_flat.reshape(N, C_out, H_out, W_out)           # already NCHW


def _reference(x_nchw, weight, bias):
    """Pure-JAX reference (same semantics as the PyTorch module)."""
    conv = jax.lax.conv_general_dilated(
        x_nchw.astype(jnp.float32), weight.astype(jnp.float32),
        window_strides=(2, 2), padding=((1, 1), (1, 1)),
        dimension_numbers=("NCHW", "OIHW", "NCHW"))
    conv = conv + bias.reshape(1, -1, 1, 1)
    mean = jnp.mean(conv, axis=(2, 3), keepdims=True)
    var = jnp.mean((conv - mean) ** 2, axis=(2, 3), keepdims=True)
    normed = (conv - mean) * jax.lax.rsqrt(var + EPS)
    return jnp.maximum(normed, 0.0)


if __name__ == "__main__":
    # Small deterministic example consistent with the module:
    # batch=2, in_planes=4, out_planes=8, spatial 16x16.
    N, C_in, H, W = 2, 4, 16, 16
    C_out = 8

    key = jax.random.PRNGKey(0)
    kx, kw, kb = jax.random.split(key, 3)
    x = jax.random.normal(kx, (N, C_in, H, W), dtype=jnp.float32)

    # Deterministic parameter init (Conv2d: kaiming-uniform-style bound).
    fan_in = C_in * 3 * 3
    bound = 1.0 / np.sqrt(fan_in)
    weight = jax.random.uniform(kw, (C_out, C_in, 3, 3),
                                minval=-bound, maxval=bound, dtype=jnp.float32)
    bias = jax.random.uniform(kb, (C_out,),
                              minval=-bound, maxval=bound, dtype=jnp.float32)

    out = jax.block_until_ready(trans_down(x, weight, bias))

    # Reference on the same bf16-rounded operands the kernel consumes; the bias
    # is kept in the reference (InstanceNorm cancels it exactly).
    ref = jax.block_until_ready(_reference(
        x.astype(jnp.bfloat16).astype(jnp.float32),
        weight.astype(jnp.bfloat16).astype(jnp.float32), bias))
    np.testing.assert_allclose(np.asarray(out), np.asarray(ref),
                               atol=2e-3, rtol=2e-3)

    print("KERNEL_OK")
</pallas_src>

<mosaic_0001>
module attributes {stable_mosaic.version = 11 : i64} {
  func.func @_trans_down_kernel(%arg0: i32, %arg1: memref<1x36x64xbf16, #tpu.memory_space<vmem>>, %arg2: memref<8x36xbf16, #tpu.memory_space<vmem>>, %arg3: memref<1x8x64xf32, #tpu.memory_space<vmem>>) attributes {dimension_semantics = [#tpu.dimension_semantics<parallel>], iteration_bounds = array<i64: 2>, scalar_prefetch = 0 : i64, scratch_operands = 0 : i64, tpu.core_type = #tpu.core_type<tc>, window_params = [{transform_indices = @transform_0, window_bounds = array<i64: 1, 36, 64>}, {pipeline_mode = #tpu.pipeline_mode<synchronous>, transform_indices = @transform_1, window_bounds = array<i64: 8, 36>}, {transform_indices = @transform_2, window_bounds = array<i64: 1, 8, 64>}]} {
    %c0 = arith.constant 0 : index
    %c0_0 = arith.constant 0 : index
    %0 = vector.load %arg2[%c0, %c0_0] : memref<8x36xbf16, #tpu.memory_space<vmem>>, vector<8x36xbf16>
    %c0_1 = arith.constant 0 : index
    %c0_2 = arith.constant 0 : index
    %c0_3 = arith.constant 0 : index
    %1 = vector.load %arg1[%c0_1, %c0_2, %c0_3] : memref<1x36x64xbf16, #tpu.memory_space<vmem>>, vector<1x36x64xbf16>
    %2 = vector.shape_cast %1 : vector<1x36x64xbf16> to vector<36x64xbf16>
    %cst = arith.constant dense<0.000000e+00> : vector<8x64xf32>
    %3 = tpu.matmul %0, %2, %cst {dimension_numbers = #tpu.dot_dimension_numbers<[1], [0], [0], [1], [0, 0, 1, 1], [], []>} : vector<8x36xbf16>, vector<36x64xbf16>, vector<8x64xf32> -> vector<8x64xf32>
    %cst_4 = arith.constant dense<0.000000e+00> : vector<8xf32>
    %4 = vector.multi_reduction <add>, %3, %cst_4 [1] : vector<8x64xf32> to vector<8xf32>
    %5 = vector.shape_cast %4 : vector<8xf32> to vector<8x1xf32>
    %cst_5 = arith.constant 1.562500e-02 : f32
    %6 = vector.broadcast %cst_5 : f32 to vector<8x1xf32>
    %7 = arith.mulf %5, %6 : vector<8x1xf32>
    %8 = arith.mulf %3, %3 : vector<8x64xf32>
    %cst_6 = arith.constant dense<0.000000e+00> : vector<8xf32>
    %9 = vector.multi_reduction <add>, %8, %cst_6 [1] : vector<8x64xf32> to vector<8xf32>
    %10 = vector.shape_cast %9 : vector<8xf32> to vector<8x1xf32>
    %cst_7 = arith.constant 1.562500e-02 : f32
    %11 = vector.broadcast %cst_7 : f32 to vector<8x1xf32>
    %12 = arith.mulf %10, %11 : vector<8x1xf32>
    %13 = arith.mulf %7, %7 : vector<8x1xf32>
    %14 = arith.subf %12, %13 : vector<8x1xf32>
    %cst_8 = arith.constant 0.000000e+00 : f32
    %15 = vector.broadcast %cst_8 : f32 to vector<8x1xf32>
    %16 = arith.maximumf %14, %15 : vector<8x1xf32>
    %17 = vector.broadcast %7 : vector<8x1xf32> to vector<8x64xf32>
    %18 = arith.subf %3, %17 : vector<8x64xf32>
    %cst_9 = arith.constant 9.99999974E-6 : f32
    %19 = vector.broadcast %cst_9 : f32 to vector<8x1xf32>
    %20 = arith.addf %16, %19 : vector<8x1xf32>
    %21 = math.rsqrt %20 : vector<8x1xf32>
    %22 = vector.broadcast %21 : vector<8x1xf32> to vector<8x64xf32>
    %23 = arith.mulf %18, %22 : vector<8x64xf32>
    %cst_10 = arith.constant 0.000000e+00 : f32
    %24 = vector.broadcast %cst_10 : f32 to vector<8x64xf32>
    %25 = arith.maximumf %23, %24 : vector<8x64xf32>
    %c0_11 = arith.constant 0 : index
    %c0_12 = arith.constant 0 : index
    %c0_13 = arith.constant 0 : index
    %26 = vector.load %arg3[%c0_11, %c0_12, %c0_13] : memref<1x8x64xf32, #tpu.memory_space<vmem>>, vector<1x8x64xf32>
    %27 = vector.shape_cast %26 : vector<1x8x64xf32> to vector<8x64xf32>
    %28 = vector.shape_cast %25 : vector<8x64xf32> to vector<1x8x64xf32>
    tpu.vector_store %arg3[%c0_11, %c0_12, %c0_13], %28 {strides = array<i32>} : memref<1x8x64xf32, #tpu.memory_space<vmem>>, vector<1x8x64xf32>,
    return
  }
  func.func @transform_0(%arg0: i32) -> (i32, i32, i32) {
    %c0_i32 = arith.constant 0 : i32
    %c0_i32_0 = arith.constant 0 : i32
    %c0_i32_1 = arith.constant 0 : i32
    return %arg0, %c0_i32, %c0_i32_0 : i32, i32, i32
  }
  func.func @transform_1(%arg0: i32) -> (i32, i32) {
    %c0_i32 = arith.constant 0 : i32
    %c0_i32_0 = arith.constant 0 : i32
    %c0_i32_1 = arith.constant 0 : i32
    return %c0_i32, %c0_i32_0 : i32, i32
  }
  func.func @transform_2(%arg0: i32) -> (i32, i32, i32) {
    %c0_i32 = arith.constant 0 : i32
    %c0_i32_0 = arith.constant 0 : i32
    %c0_i32_1 = arith.constant 0 : i32
    return %arg0, %c0_i32, %c0_i32_0 : i32, i32, i32
  }
}

</mosaic_0001>

<bundles_post_ra>
// kernel: tpu_custom_call.1
= control target key start
LH: loop header
LB: loop body
LE: loop exit
PB: predicated region body
PF: predicated region fallthrough
CT: control target
= control target key end

     0   :  { %7 = vsyncpa [#allocation3], 0  ;;  %s552_s0 = inlined_call_operand.vmem [shape: bf16[2,36,64], index: 0, kind: input, shape index: {}]   ;;  %s553_s1 = inlined_call_operand.vmem [shape: bf16[8,36], index: 1, kind: input, shape index: {}]   ;;  %s554_s2 = inlined_call_operand.hbm [shape: f32[2,8,64], index: 2, kind: output, shape index: {}]  }
   0x1   :  { %9 = vsyncpa [#allocation3 + $0x1], 0  ;;  %s459_s9 = smov 0   ;;  %s461_s10 = smov 0  }
   0x2   :  { %s463_s11 = smov 0   ;;  %s465_s12 = smov 0  }
   0x3 LB: > { %s480_s13 = sadd.s32 4294967295, %s439_s12   ;;  %s304_s14 = sadd.s32 4294967294, %s439_s12   ;;  %s439_s12 = sphi %s465_s12, %s560_s12   ;;  %s435_s11 = sphi %s463_s11, %s559_s11   ;;  %s431_s10 = sphi %s461_s10, %s558_s10   ;;  %s427_s9 = sphi %s459_s9, %s557_s9  }
   0x4   : > { %s484_s15 = sadd.s32 1, %s439_s12   ;;  %s69_s16 = sadd.s32 1, %s435_s11 }
   0x5   : > { %s66_s17 = ssub.s32 %s439_s12, %s484_s15  ;;  %p79_p0 = scmp.ne.s32.totalorder %s435_s11, %s431_s10 }
   0x6   : > { %p67_p1 = scmp.eq.s32.totalorder %s66_s17, 0  ;;  %p80_p2 = scmp.eq.s32.totalorder %s480_s13, 1 }
   0x7   : > { %p85_p3 = scmp.ne.s32.totalorder %s431_s10, %s427_s9  ;;  %p86_p4 = scmp.eq.s32.totalorder %s304_s14, 1 }
   0x8   : > { %s495_s18 = scalar_select %p67_p1, %s435_s11, %s69_s16  }
   0x9   : > { %p497_p5 = por %p80_p2, %p79_p0  ;;  %p501_p6 = por %p86_p4, %p85_p3 }
   0xa   : > { %p307_p7 = scmp.ge.s32.totalorder %s439_s12, 1  ;;  %p115_p8 = scmp.lt.s32.totalorder %s439_s12, 3 }
   0xc   : > { %p116_p9 = pnand %p307_p7, %p115_p8 }
   0xd   : > { %p137_p10 = scmp.lt.s32.totalorder (!%p116_p9), %s480_s13, 1  ;;  %s134_s28 = sand.u32 (!%p116_p9), 1, %s431_s10  }
   0xe   : > { %119 = sbr.rel (%p116_p9) target bundleno = 412 (0x19c), region = 28  ;;  %s308_s29 = sshll.u32 (!%p116_p9), %s134_s28, 3 }
   0xf   : > { %s315_s30 = sshll.u32 (!%p116_p9), %s480_s13, 7  ;;  %s136_s3 = scalar_lea.vmem (!%p116_p9), [#allocation2], %s308_s29 }
  0x10   : > { %s245_s4 = sshll.u32 (!%p116_p9), %s136_s3, 4  ;;  %s243_s7 = scalar_lea.hbm (!%p116_p9), %s554_s2, %s315_s30  ;;  %s246_s4 = int_to_ptr.vmem [resolvable:$true] %s245_s4 }
  0x11   : > { %s232_s8 = scalar_lea.sflag (!%p116_p9), [#allocation3], %s134_s28  ;;  %s379_s14 = scalar_lea.vmem (!%p116_p9), %s246_s4, 128 }
  0x12   : > { %p380_p11 = scmp.ne.s32.totalorder (!%p116_p9), %s246_s4, %s379_s14  ;;  %s443_s16 = smov (!%p116_p9), [#allocation2]  }
  0x13   : > { %v441_v0 = vmov 0.0   ;;  %vm442_vm0 = vmmov 0   ;;  %s138_s21 = scalar_select %p137_p10, %s480_s13, 1  ;;  %vm168_vm1 = vcmask 1041408   ;;  %v143_v5 = vld [vmem:[%s553_s1] sm:$0xf] }
  0x14   : > { %322 = vmatprep.subr.bf16.mxu0 %v441_v0  ;;  %328 = vmatprep.mubr.msk.bf16.mxu0 %vm442_vm0, %v441_v0  ;;  %vm164_vm2 = vcmask 293888   ;;  %vm212_vm3 = vcmask 523264   ;;  %p381_p12 = pnand %p380_p11, %p497_p5  ;;  %s383_s17 = sshll.u32 %s443_s16, 4  ;;  %s384_s17 = int_to_ptr.vmem [resolvable:$false] %s383_s17 }
  0x15   : > { %s332_s22 = smul.u32 20, %s138_s21  ;;  %s385_s13 = scalar_lea.vmem %s384_s17, 256 }
  0x16   : > { %p382_p13 = pneg %p381_p12  ;;  %p386_p0 = scmp.lt.s32.totalorder %s246_s4, %s384_s17 }
  0x17   : > { %s141_s25 = scalar_lea.vmem %s552_s0, %s332_s22  ;;  %p387_p1 = scmp.lt.s32.totalorder %s385_s13, %s379_s14 }
  0x18   : > { %v374_v1 = vld [vmem:[%s141_s25 + $0x10] ss:$0 sps:$4 sm:$0x33]   ;;  %v375_v3 = vld [vmem:[%s141_s25 + $0x8] sm:$0xff]   ;;  %v376_v4 = vld [vmem:[%s141_s25] sm:$0xff]  }
  0x19   : > { %v170_v2 = vsel %vm168_vm1, %v374_v1, 0  ;;  %p388_p2 = por %p387_p1, %p386_p0 }
  0x1a   : > { %323 = vmatpush3.bf16.msra.mxu0 %v170_v2 }
  0x1b   : > { %324 = vmatprep.subr.bf16.mxu0 %v441_v0  ;;  %p389_p3 = pnand %p388_p2, %p382_p13 }
  0x1e   : > { %325 = vmatpush3.bf16.msra.mxu0 %v375_v3 }
  0x1f   : > { %326 = vmatprep.subr.bf16.mxu0 %v441_v0 }
  0x22   : > { %327 = vmatpush3.bf16.msra.mxu0 %v376_v4 }
  0x25   : > { %329 = vmatmul.mubr.msk.bf16.vlgmr.msra.gmra.mxu0 %vm164_vm2, %v143_v5 }
  0xe5   : > { %v206_v6 = vpop.f32.mrf.mxu0 }
  0xe6   : > { %v213_v7 = vsel %vm212_vm3, %v206_v6, 0.0  ;;  %v217_v8 = vmul.f32 %v206_v6, %v206_v6 }
  0xe7   : > { %214 = vadd.xlane.f32.xlu0 %v213_v7  ;;  %v330_v9 = vpop.f32.mrf.mxu0 }
  0xe8   : > { %v218_v11 = vsel %vm212_vm3, %v217_v8, 0.0 }
  0xe9   : > { %v209_v10 = vpop.f32.mrf.mxu0 }
  0xeb   : > { %219 = vadd.xlane.f32.xlu0 %v218_v11  ;;  %v331_v12 = vpop.f32.mrf.mxu0 }
 0x170   : > { %v215_v13 = vpop.xlane.xlu0 %214 }
 0x171   : > { %v216_v14 = vmul.f32 0.015625, %v215_v13 }
 0x173   : > { %v222_v16 = vmul.f32 %v216_v14, %v216_v14  ;;  %v225_v21 = vsub.f32 %v206_v6, %v216_v14 }
 0x174   : > { %v220_v15 = vpop.xlane.xlu0 %219 }
 0x175   : > { %v221_v17 = vmul.f32 0.015625, %v220_v15 }
 0x177   : > { %v223_v18 = vsub.f32 %v221_v17, %v222_v16 }
 0x179   : > { %v224_v19 = vmax.f32 %v223_v18, 0.0 }
 0x17b   : > { %v226_v20 = vadd.f32 1e-05, %v224_v19 }
 0x17d   : > { %377 = vrsqrt.f32 %v226_v20 }
 0x18a   : > { %v378_v22 = vpop.eup %377 }
 0x18b   : > { %v228_v23 = vmul.f32 %v378_v22, %v225_v21 }
 0x18d   : > { %v229_v24 = vmax.f32 %v228_v23, 0.0 }
 0x18f   : > { %230 = vst.msk [vmem:[%s136_s3] sm:$0xff] %vm212_vm3, %v229_v24 }
 0x190   : > { %392 = shalt.err (!%p389_p3)
}
 0x191   : > { %s393_s21 = scalar_lea.hbm %s243_s7, 128  ;;  %s397_s24 = scalar_lea.hbm %s554_s2, 256 }
 0x192   : > { %p394_p4 = scmp.ne.s32.totalorder %s243_s7, %s393_s21  ;;  %p398_p9 = scmp.lt.s32.totalorder %s243_s7, %s554_s2 }
 0x193   : > { %p399_p10 = scmp.lt.s32.totalorder %s397_s24, %s393_s21 }
 0x194   : > { %p395_p7 = pnand %p394_p4, %p497_p5 }
 0x195   : > { %p400_p11 = por %p399_p10, %p398_p9 }
 0x196   : > { %p396_p8 = pneg %p395_p7 }
 0x198   : > { %p401_p12 = pnand %p400_p11, %p396_p8 }
 0x19a   : > { %404 = shalt.err (!%p401_p12)
}
 0x19b   : > { %333 = dma.vmem_to_hbm [thread:$0]  (%p497_p5), %s246_s4, 128, %s243_s7, %s232_s8  }
 0x19c PF: > { %p339_p13 = scmp.ge.s32.totalorder %s439_s12, 2  ;;  %s257_s27 = sand.u32 1, %s427_s9  }
 0x19d   : > { %s258_s28 = scalar_lea.sflag [#allocation3], %s257_s27 }
 0x19e   : > { %p336_p0 = pnand %p339_p13, %p501_p6 }
 0x1a0   : > { %p337_p1 = pneg %p336_p0 }
 0x1a2   : > { %422 = dma.done.wait (%p337_p1), %s258_s28, 128  }
 0x1a3   : > { %424 = vsyncadd (%p337_p1), %s258_s28, 4294967168  ;;  %p12_p2 = scmp.ge.s32.totalorder %s484_s15, 4   ;;  %s557_s9 = smov %s431_s10 }
 0x1a4   : > { %s558_s10 = smov %s435_s11  ;;  %s559_s11 = smov %s495_s18 }
 0x1a5   : > { %s560_s12 = smov %s484_s15  ;;  %14 = sbr.rel (!%p12_p2) target bundleno = 3 (0x3), region = 63 }
 0x1aa   :  { %263 = vsyncpa [#allocation3], 1 }
 0x1ab   :  { %265 = vsyncpa [#allocation3 + $0x1], 1 }

</bundles_post_ra>
